<compile_context>
chip_gen: v7x
topology: tpu7x:2x2x1
jax: 0.10.0
libtpu: 0.0.40
codegen_flags: <defaults>
</compile_context>

<pallas_src>
import jax
import jax.numpy as jnp
from jax.experimental import pallas as pl
from jax.experimental.pallas import tpu as pltpu


def _round_up(x, m):
    return ((x + m - 1) // m) * m


def _classifier_kernel(x_ref, gamma_ref, beta_ref, w_ref, b_ref, out_ref):
    # x_ref: (TB, H) CLS-token tile.
    x = x_ref[...].astype(jnp.float32)

    # LayerNorm over the hidden axis (eps=1e-5, biased variance; matches
    # torch.nn.LayerNorm).  H=128 -> a single clean lane reduction per row.
    mean = jnp.mean(x, axis=-1, keepdims=True)          # (TB, 1)
    xc = x - mean
    var = jnp.mean(xc * xc, axis=-1, keepdims=True)     # (TB, 1)
    inv = jax.lax.rsqrt(var + 1e-5)
    y = xc * inv * gamma_ref[...] + beta_ref[...]       # (TB, H)

    # Linear: logits = y @ W^T + b.  w_ref is pre-transposed & zero-padded
    # to (H, C_pad); lane-dense output tile.
    logits = jnp.dot(y, w_ref[...], preferred_element_type=jnp.float32)
    out_ref[...] = (logits + b_ref[...]).astype(out_ref.dtype)


def transtab_linear_classifier(x, gamma, beta, weight, bias, *, block_b=None):
    """x: (B, S, H); weight: (num_class, H) (PyTorch layout); bias: (num_class,)."""
    B, S, H = x.shape
    C = weight.shape[0]
    assert H % 128 == 0, "hidden_dim must be a multiple of 128 (module default 128)"

    # --- Parameter glue (kernel-friendly layouts, lane-dense padded C). ---
    C_pad = _round_up(max(C, 128), 128)
    w_t = jnp.zeros((H, C_pad), weight.dtype).at[:, :C].set(weight.T)   # (H, C_pad)
    bias_p = jnp.zeros((1, C_pad), bias.dtype).at[:, :C].set(bias.reshape(1, C))
    gamma2 = gamma.reshape(1, H)
    beta2 = beta.reshape(1, H)

    # --- Batch tiling.  Small enough for v7x's 64 MiB VMEM with room to
    #     double-buffer; large enough to amortize per-step overhead on v5e/v6e.
    if block_b is None:
        block_b = min(_round_up(B, 8), 512)
    B_pad = _round_up(B, block_b)

    # 2-D view of x: (B, S*H).  The CLS token is columns [0, H) -> block 0 on
    # axis 1.  Free (row-major) reshape; only CLS rows are DMA'd into VMEM.
    x2 = x.reshape(B, S * H)
    if B_pad != B:
        x2 = jnp.pad(x2, ((0, B_pad - B), (0, 0)))  # zero rows: LN of zeros is finite

    out = pl.pallas_call(
        _classifier_kernel,
        out_shape=jax.ShapeDtypeStruct((B_pad, C_pad), jnp.float32),
        grid_spec=pl.GridSpec(
            grid=(B_pad // block_b,),
            in_specs=[
                # CLS-token tile: (TB, H) at column-block 0 of the (B, S*H) view.
                pl.BlockSpec((block_b, H), lambda i: (i, 0)),
                # Params stay VMEM-resident across grid steps.
                pl.BlockSpec((1, H), lambda i: (0, 0)),
                pl.BlockSpec((1, H), lambda i: (0, 0)),
                pl.BlockSpec((H, C_pad), lambda i: (0, 0)),
                pl.BlockSpec((1, C_pad), lambda i: (0, 0)),
            ],
            out_specs=pl.BlockSpec((block_b, C_pad), lambda i: (i, 0)),
        ),
        compiler_params=pltpu.CompilerParams(
            dimension_semantics=("parallel",)),
    )(x2, gamma2, beta2, w_t, bias_p)

    # Strip batch / class padding.
    return out[:B, :C]


def _reference(x, gamma, beta, weight, bias, eps=1e-5):
    xc = x[:, 0, :].astype(jnp.float32)
    mean = jnp.mean(xc, axis=-1, keepdims=True)
    var = jnp.mean((xc - mean) ** 2, axis=-1, keepdims=True)
    y = (xc - mean) / jnp.sqrt(var + eps) * gamma + beta
    return y @ weight.T + bias


if __name__ == "__main__":
    # Module-consistent small shapes: hidden_dim=128 (default), num_class=16.
    B, S, H, C = 8, 4, 128, 16

    key = jax.random.PRNGKey(0)
    kx, kw, kb, kg, kbe = jax.random.split(key, 5)

    x = jax.random.normal(kx, (B, S, H), dtype=jnp.float32)
    weight = jax.random.normal(kw, (C, H), dtype=jnp.float32) * 0.05   # fc.weight
    bias = jax.random.normal(kb, (C,), dtype=jnp.float32) * 0.01       # fc.bias
    gamma = 1.0 + 0.1 * jax.random.normal(kg, (H,), dtype=jnp.float32)  # norm.weight
    beta = 0.1 * jax.random.normal(kbe, (H,), dtype=jnp.float32)        # norm.bias

    out = transtab_linear_classifier(x, gamma, beta, weight, bias)
    out = jax.block_until_ready(out)

    ref = _reference(x, gamma, beta, weight, bias)
    assert out.shape == (B, C)
    assert jnp.allclose(out, ref, atol=1e-4, rtol=1e-4), (
        f"max err {jnp.max(jnp.abs(out - ref))}")

    print("KERNEL_OK")
</pallas_src>

<mosaic_0001>
module attributes {stable_mosaic.version = 11 : i64} {
  func.func @_classifier_kernel(%arg0: i32, %arg1: memref<8x128xf32, #tpu.memory_space<vmem>>, %arg2: memref<1x128xf32, #tpu.memory_space<vmem>>, %arg3: memref<1x128xf32, #tpu.memory_space<vmem>>, %arg4: memref<128x128xf32, #tpu.memory_space<vmem>>, %arg5: memref<1x128xf32, #tpu.memory_space<vmem>>, %arg6: memref<8x128xf32, #tpu.memory_space<vmem>>) attributes {dimension_semantics = [#tpu.dimension_semantics<parallel>], iteration_bounds = array<i64: 1>, scalar_prefetch = 0 : i64, scratch_operands = 0 : i64, tpu.core_type = #tpu.core_type<tc>, window_params = [{transform_indices = @transform_0, window_bounds = array<i64: 8, 128>}, {pipeline_mode = #tpu.pipeline_mode<synchronous>, transform_indices = @transform_1, window_bounds = array<i64: 1, 128>}, {pipeline_mode = #tpu.pipeline_mode<synchronous>, transform_indices = @transform_2, window_bounds = array<i64: 1, 128>}, {pipeline_mode = #tpu.pipeline_mode<synchronous>, transform_indices = @transform_3, window_bounds = array<i64: 128, 128>}, {pipeline_mode = #tpu.pipeline_mode<synchronous>, transform_indices = @transform_4, window_bounds = array<i64: 1, 128>}, {transform_indices = @transform_5, window_bounds = array<i64: 8, 128>}]} {
    %c0 = arith.constant 0 : index
    %c0_0 = arith.constant 0 : index
    %0 = vector.load %arg1[%c0, %c0_0] : memref<8x128xf32, #tpu.memory_space<vmem>>, vector<8x128xf32>
    %cst = arith.constant dense<0.000000e+00> : vector<8xf32>
    %1 = vector.multi_reduction <add>, %0, %cst [1] : vector<8x128xf32> to vector<8xf32>
    %2 = vector.shape_cast %1 : vector<8xf32> to vector<8x1xf32>
    %cst_1 = arith.constant 1.280000e+02 : f32
    %3 = vector.broadcast %cst_1 : f32 to vector<8x1xf32>
    %4 = arith.divf %2, %3 : vector<8x1xf32>
    %5 = vector.broadcast %4 : vector<8x1xf32> to vector<8x128xf32>
    %6 = arith.subf %0, %5 : vector<8x128xf32>
    %7 = arith.mulf %6, %6 : vector<8x128xf32>
    %cst_2 = arith.constant dense<0.000000e+00> : vector<8xf32>
    %8 = vector.multi_reduction <add>, %7, %cst_2 [1] : vector<8x128xf32> to vector<8xf32>
    %9 = vector.shape_cast %8 : vector<8xf32> to vector<8x1xf32>
    %cst_3 = arith.constant 1.280000e+02 : f32
    %10 = vector.broadcast %cst_3 : f32 to vector<8x1xf32>
    %11 = arith.divf %9, %10 : vector<8x1xf32>
    %cst_4 = arith.constant 9.99999974E-6 : f32
    %12 = vector.broadcast %cst_4 : f32 to vector<8x1xf32>
    %13 = arith.addf %11, %12 : vector<8x1xf32>
    %14 = math.rsqrt %13 : vector<8x1xf32>
    %15 = vector.broadcast %14 : vector<8x1xf32> to vector<8x128xf32>
    %16 = arith.mulf %6, %15 : vector<8x128xf32>
    %c0_5 = arith.constant 0 : index
    %c0_6 = arith.constant 0 : index
    %17 = vector.load %arg2[%c0_5, %c0_6] : memref<1x128xf32, #tpu.memory_space<vmem>>, vector<1x128xf32>
    %18 = vector.broadcast %17 : vector<1x128xf32> to vector<8x128xf32>
    %19 = arith.mulf %16, %18 : vector<8x128xf32>
    %c0_7 = arith.constant 0 : index
    %c0_8 = arith.constant 0 : index
    %20 = vector.load %arg3[%c0_7, %c0_8] : memref<1x128xf32, #tpu.memory_space<vmem>>, vector<1x128xf32>
    %21 = vector.broadcast %20 : vector<1x128xf32> to vector<8x128xf32>
    %22 = arith.addf %19, %21 : vector<8x128xf32>
    %c0_9 = arith.constant 0 : index
    %c0_10 = arith.constant 0 : index
    %23 = vector.load %arg4[%c0_9, %c0_10] : memref<128x128xf32, #tpu.memory_space<vmem>>, vector<128x128xf32>
    %cst_11 = arith.constant dense<0.000000e+00> : vector<8x128xf32>
    %24 = tpu.matmul %22, %23, %cst_11 {dimension_numbers = #tpu.dot_dimension_numbers<[1], [0], [0], [1], [0, 0, 1, 1], [], []>} : vector<8x128xf32>, vector<128x128xf32>, vector<8x128xf32> -> vector<8x128xf32>
    %c0_12 = arith.constant 0 : index
    %c0_13 = arith.constant 0 : index
    %25 = vector.load %arg5[%c0_12, %c0_13] : memref<1x128xf32, #tpu.memory_space<vmem>>, vector<1x128xf32>
    %26 = vector.broadcast %25 : vector<1x128xf32> to vector<8x128xf32>
    %27 = arith.addf %24, %26 : vector<8x128xf32>
    %c0_14 = arith.constant 0 : index
    %c0_15 = arith.constant 0 : index
    %28 = vector.load %arg6[%c0_14, %c0_15] : memref<8x128xf32, #tpu.memory_space<vmem>>, vector<8x128xf32>
    tpu.vector_store %arg6[%c0_14, %c0_15], %27 {strides = array<i32>} : memref<8x128xf32, #tpu.memory_space<vmem>>, vector<8x128xf32>,
    return
  }
  func.func @transform_0(%arg0: i32) -> (i32, i32) {
    %c0_i32 = arith.constant 0 : i32
    %c0_i32_0 = arith.constant 0 : i32
    return %arg0, %c0_i32 : i32, i32
  }
  func.func @transform_1(%arg0: i32) -> (i32, i32) {
    %c0_i32 = arith.constant 0 : i32
    %c0_i32_0 = arith.constant 0 : i32
    %c0_i32_1 = arith.constant 0 : i32
    return %c0_i32, %c0_i32_0 : i32, i32
  }
  func.func @transform_2(%arg0: i32) -> (i32, i32) {
    %c0_i32 = arith.constant 0 : i32
    %c0_i32_0 = arith.constant 0 : i32
    %c0_i32_1 = arith.constant 0 : i32
    return %c0_i32, %c0_i32_0 : i32, i32
  }
  func.func @transform_3(%arg0: i32) -> (i32, i32) {
    %c0_i32 = arith.constant 0 : i32
    %c0_i32_0 = arith.constant 0 : i32
    %c0_i32_1 = arith.constant 0 : i32
    return %c0_i32, %c0_i32_0 : i32, i32
  }
  func.func @transform_4(%arg0: i32) -> (i32, i32) {
    %c0_i32 = arith.constant 0 : i32
    %c0_i32_0 = arith.constant 0 : i32
    %c0_i32_1 = arith.constant 0 : i32
    return %c0_i32, %c0_i32_0 : i32, i32
  }
  func.func @transform_5(%arg0: i32) -> (i32, i32) {
    %c0_i32 = arith.constant 0 : i32
    %c0_i32_0 = arith.constant 0 : i32
    return %arg0, %c0_i32 : i32, i32
  }
}

</mosaic_0001>

<bundles_post_ra>
// kernel: tpu_custom_call.1
= control target key start
LH: loop header
LB: loop body
LE: loop exit
PB: predicated region body
PF: predicated region fallthrough
CT: control target
= control target key end

     0   :  { %10 = vsyncpa [#allocation3], 0  ;;  %s440_s0 = inlined_call_operand.hbm [shape: f32[8,512], index: 0, kind: input, shape index: {}]   ;;  %s441_s1 = inlined_call_operand.vmem [shape: f32[1,128], index: 1, kind: input, shape index: {}]   ;;  %s442_s2 = inlined_call_operand.vmem [shape: f32[1,128], index: 2, kind: input, shape index: {}]   ;;  %s443_s3 = inlined_call_operand.hbm [shape: f32[128,128], index: 3, kind: input, shape index: {}]   ;;  %s444_s4 = inlined_call_operand.vmem [shape: f32[1,128], index: 4, kind: input, shape index: {}]   ;;  %s445_s5 = inlined_call_operand.hbm [shape: f32[8,128], index: 5, kind: output, shape index: {}]  }
   0x1   :  { %11 = vsyncpa [#allocation6], 0 }
   0x2   :  { %12 = vsyncpa [#allocation4], 0  ;;  %s347_s18 = smov [#allocation2]   ;;  %s348_s20 = smov [#allocation5]  }
   0x3   :  { %s19_s19 = sshll.u32 %s347_s18, 4  ;;  %s32_s21 = sshll.u32 %s348_s20, 4  ;;  %s20_s19 = int_to_ptr.vmem [resolvable:$true] %s19_s19  ;;  %s385_s21 = int_to_ptr.vmem [resolvable:$true] %s32_s21 }
   0x4   :  { %s275_s24 = scalar_lea.hbm %s440_s0, 128  ;;  %s277_s29 = scalar_lea.hbm %s440_s0, 512 }
   0x5   :  { %p276_p0 = scmp.ne.s32.totalorder %s440_s0, %s275_s24  ;;  %p278_p1 = scmp.lt.u32.totalorder %s277_s29, %s275_s24 }
   0x6   :  { %p279_p2 = scmp.lt.u32.totalorder %s275_s24, %s440_s0 }
   0x8   :  { %p280_p3 = por %p279_p2, %p278_p1 }
   0xa   :  { %p281_p4 = pnand %p280_p3, %p276_p0 }
   0xc   :  { %284 = shalt.err (!%p281_p4)
}
   0xd   :  { %s285_s7 = scalar_lea.vmem %s20_s19, 128  ;;  %p290_p6 = scmp.lt.s32.totalorder %s20_s19, %s20_s19 }
   0xe   :  { %p286_p5 = scmp.ne.s32.totalorder %s20_s19, %s285_s7  ;;  %p291_p7 = scmp.lt.s32.totalorder %s285_s7, %s285_s7 }
  0x10   :  { %p292_p8 = por %p291_p7, %p290_p6 }
  0x12   :  { %p293_p9 = pnand %p292_p8, %p286_p5 }
  0x14   :  { %296 = shalt.err (!%p293_p9)
}
  0x15   :  { %22 = dma.hbm_to_vmem [thread:$0]  %s440_s0, 128, %s20_s19, [#allocation3]  }
  0x16   :  { %s297_s12 = scalar_lea.hbm %s443_s3, 2048 }
  0x17   :  { %p298_p10 = scmp.ne.s32.totalorder %s443_s3, %s297_s12  ;;  %p301_p11 = scmp.lt.u32.totalorder %s297_s12, %s443_s3 }
  0x19   :  { %p303_p12 = pnand %p301_p11, %p298_p10 }
  0x1b   :  { %306 = shalt.err (!%p303_p12)
}
  0x1c   :  { %s307_s17 = scalar_lea.vmem %s385_s21, 2048  ;;  %p312_p0 = scmp.lt.s32.totalorder %s385_s21, %s385_s21 }
  0x1d   :  { %p308_p13 = scmp.ne.s32.totalorder %s385_s21, %s307_s17  ;;  %p313_p1 = scmp.lt.s32.totalorder %s307_s17, %s307_s17 }
  0x1f   :  { %p314_p2 = por %p313_p1, %p312_p0 }
  0x21   :  { %p315_p3 = pnand %p314_p2, %p308_p13 }
  0x23   :  { %318 = shalt.err (!%p315_p3)
}
  0x24   :  { %s349_s0 = smov 128   ;;  %s350_s18 = smov 8  }
  0x25   :  { %38 = dma.hbm_to_vmem [thread:$0]  %s443_s3, 2048, %s385_s21, [#allocation6], %s349_s0, %s349_s0, %s350_s18  }
  0x26   :  { %341 = dma.done.wait [#allocation3], 128  }
  0x27   :  { %342 = vsyncadd [#allocation3], 4294967168 }
  0x28   :  { %343 = dma.done.wait [#allocation6], 2048  }
  0x29   :  { %344 = vsyncadd [#allocation6], 4294965248  ;;  %v47_v0 = vld [vmem:[#allocation2] sm:$0xff]  ;;  %v76_v1 = vld [vmem:[#allocation5] sm:$0xff]  ;;  %v351_v4 = vmov 0.0|0.0   ;;  %vm352_vm0 = vmmov 0  }
  0x2a   :  { %48 = vadd.xlane.f32.xlu0 %v47_v0  ;;  %v77_v2 = vld [vmem:[#allocation5 + $0x8] sm:$0xff]  ;;  %v78_v3 = vld [vmem:[#allocation5 + $0x10] sm:$0xff]  ;;  %241 = vmatprep.subr.bf16.mxu0 %v351_v4  ;;  %v79_v6 = vld [vmem:[#allocation5 + $0x18] sm:$0xff]  ;;  %v353_v23 = vmov 0.0   ;;  %s354_s26 = smov [#allocation7]  }
  0x2b   :  { %v242_v5 = vpack.c.bf16 %v77_v2, %v76_v1  ;;  %v245_v7 = vpack.c.bf16 %v79_v6, %v78_v3  ;;  %v80_v8 = vld [vmem:[#allocation5 + $0x20] sm:$0xff]  ;;  %v81_v9 = vld [vmem:[#allocation5 + $0x28] sm:$0xff]  ;;  %v82_v15 = vld [vmem:[#allocation5 + $0x30] sm:$0xff]  ;;  %238 = vmatprep.mubr.msk.f32.mxu0 %vm352_vm0, %v353_v23  ;;  %s176_s27 = sshll.u32 %s354_s26, 4  ;;  %s177_s27 = int_to_ptr.vmem [resolvable:$true] %s176_s27 }
  0x2c   :  { %v248_v10 = vpack.c.bf16 %v81_v9, %v80_v8  ;;  %v83_v16 = vld [vmem:[#allocation5 + $0x38] sm:$0xff]  ;;  %v84_v18 = vld [vmem:[#allocation5 + $0x40] sm:$0xff]  ;;  %v85_v19 = vld [vmem:[#allocation5 + $0x48] sm:$0xff]  ;;  %p324_p5 = scmp.lt.s32.totalorder %s177_s27, %s177_s27 }
  0x2d   :  { %243 = vmatpush3.bf16.msra.mxu0 %v242_v5  ;;  %v251_v17 = vpack.c.bf16 %v83_v16, %v82_v15  ;;  %v254_v20 = vpack.c.bf16 %v85_v19, %v84_v18  ;;  %v86_v21 = vld [vmem:[#allocation5 + $0x50] sm:$0xff]  ;;  %v87_v22 = vld [vmem:[#allocation5 + $0x58] sm:$0xff]  ;;  %v88_v25 = vld [vmem:[#allocation5 + $0x60] sm:$0xff] }
  0x2e   :  { %244 = vmatprep.subr.bf16.mxu0 %v351_v4  ;;  %v257_v24 = vpack.c.bf16 %v87_v22, %v86_v21  ;;  %v89_v26 = vld [vmem:[#allocation5 + $0x68] sm:$0xff]  ;;  %v90_v28 = vld [vmem:[#allocation5 + $0x70] sm:$0xff]  ;;  %v91_v29 = vld [vmem:[#allocation5 + $0x78] sm:$0xff] }
  0x2f   :  { %v260_v27 = vpack.c.bf16 %v89_v26, %v88_v25  ;;  %v263_v30 = vpack.c.bf16 %v91_v29, %v90_v28  ;;  %v186_v35 = vld [vmem:[%s441_s1] ss:$0 sm:$0xff]  ;;  %s319_s1 = scalar_lea.vmem %s177_s27, 128 }
  0x30   :  { %v187_v37 = vld [vmem:[%s442_s2] ss:$0 sm:$0xff]  ;;  %p320_p4 = scmp.ne.s32.totalorder %s177_s27, %s319_s1  ;;  %p325_p6 = scmp.lt.s32.totalorder %s319_s1, %s319_s1 }
  0x31   :  { %246 = vmatpush3.bf16.msra.mxu0 %v245_v7  ;;  %v188_v40 = vld [vmem:[%s444_s4] ss:$0 sm:$0xff] }
  0x32   :  { %247 = vmatprep.subr.bf16.mxu0 %v351_v4  ;;  %p326_p7 = por %p325_p6, %p324_p5 }
  0x34   :  { %p327_p8 = pnand %p326_p7, %p320_p4 }
  0x35   :  { %249 = vmatpush3.bf16.msra.mxu0 %v248_v10 }
  0x36   :  { %250 = vmatprep.subr.bf16.mxu0 %v351_v4 }
  0x39   :  { %252 = vmatpush3.bf16.msra.mxu0 %v251_v17 }
  0x3a   :  { %253 = vmatprep.subr.bf16.mxu0 %v351_v4 }
  0x3d   :  { %255 = vmatpush3.bf16.msra.mxu0 %v254_v20 }
  0x3e   :  { %256 = vmatprep.subr.bf16.mxu0 %v351_v4 }
  0x41   :  { %258 = vmatpush3.bf16.msra.mxu0 %v257_v24 }
  0x42   :  { %259 = vmatprep.subr.bf16.mxu0 %v351_v4 }
  0x45   :  { %261 = vmatpush3.bf16.msra.mxu0 %v260_v27 }
  0x46   :  { %262 = vmatprep.subr.bf16.mxu0 %v351_v4 }
  0x49   :  { %264 = vmatpush3.bf16.msra.mxu0 %v263_v30 }
  0xb7   :  { %v49_v11 = vpop.xlane.xlu0 %48 }
  0xb8   :  { %v51_v12 = vmul.f32 0.0078125, %v49_v11 }
  0xba   :  { %v52_v13 = vsub.f32 %v47_v0, %v51_v12 }
  0xbc   :  { %v53_v14 = vmul.f32 %v52_v13, %v52_v13 }
  0xbe   :  { %54 = vadd.xlane.f32.xlu0 %v53_v14 }
 0x14b   :  { %v55_v31 = vpop.xlane.xlu0 %54 }
 0x14c   :  { %v56_v32 = vmul.f32 0.0078125, %v55_v31 }
 0x14e   :  { %v57_v33 = vadd.f32 1e-05, %v56_v32 }
 0x150   :  { %273 = vrsqrt.f32 %v57_v33 }
 0x15a   :  { %v274_v34 = vpop.eup %273 }
 0x15b   :  { %v59_v36 = vmul.f32 %v274_v34, %v52_v13 }
 0x15d   :  { %v67_v38 = vmul.f32 %v186_v35, %v59_v36 }
 0x15f   :  { %v75_v39 = vadd.f32 %v187_v37, %v67_v38 }
 0x161   :  { %239 = vmatmul.mubr.f32.vlgmr.msra.gmra.mrb[0].mxu0 %v75_v39 }
 0x234   :  { %v165_v41 = vpop.f32.mrb[0].mxu0 }
 0x235   :  { %v166_v42 = vadd.f32 %v188_v40, %v165_v41  ;;  %v240_v43 = vpop.f32.mrb[1].mxu0 }
 0x237   :  { %169 = vst [vmem:[#allocation7] sm:$0xff] %v166_v42 }
 0x238   :  { %330 = shalt.err (!%p327_p8)
}
 0x239   :  { %s331_s29 = scalar_lea.hbm %s445_s5, 128 }
 0x23a   :  { %p332_p9 = scmp.ne.s32.totalorder %s445_s5, %s331_s29  ;;  %p335_p10 = scmp.lt.u32.totalorder %s331_s29, %s445_s5 }
 0x23c   :  { %p337_p11 = pnand %p335_p10, %p332_p9 }
 0x23e   :  { %340 = shalt.err (!%p337_p11)
}
 0x23f   :  { %179 = dma.vmem_to_hbm [thread:$0]  %s177_s27, 128, %s445_s5, [#allocation4]  }
 0x240   :  { %345 = dma.done.wait [#allocation4], 128  }
 0x241   :  { %346 = vsyncadd [#allocation4], 4294967168 }
 0x242   :  { %183 = vsyncpa [#allocation3], 1 }
 0x243   :  { %184 = vsyncpa [#allocation6], 1 }
 0x244   :  { %185 = vsyncpa [#allocation4], 1 }

</bundles_post_ra>
